<compile_context>
chip_gen: v7x
topology: tpu7x:2x2x1
jax: 0.10.0
libtpu: 0.0.40
codegen_flags: <defaults>
</compile_context>

<pallas_src>
import numpy as np
import jax
import jax.numpy as jnp
from jax.experimental import pallas as pl
from jax.experimental.pallas import tpu as pltpu


def _make_convsc_kernel(H, W, C_in, C_out, K, P, groups, eps, act_norm):
    M = H * W
    KK = K * K
    Cg = C_out // groups
    taps = [(ki - P, kj - P) for ki in range(K) for kj in range(K)]

    def kernel(x_ref,      # (1, C_in, M)   input image, channels-first, flattened HW
               mask_ref,   # (KK, M)        0/1 float border-validity mask per tap
               w_ref,      # (C_out, KK*C_in)  conv weight, tap-major / channel-minor
               b_ref,      # (C_out, 1)     conv bias
               g_ref,      # (C_out, 1)     GroupNorm gamma
               beta_ref,   # (C_out, 1)     GroupNorm beta
               o_ref):     # (1, C_out, M)
        x = x_ref[0]                                       # (C_in, M) f32

        # Build the K*K spatially shifted copies of the image with lane rotations
        # (XLU) and zero the wrapped / out-of-image pixels with precomputed masks.
        cols = []
        for t, (di, dj) in enumerate(taps):
            s = di * W + dj                                # flattened spatial shift
            if s == 0:
                cols.append(x)                             # center tap: no shift, all-valid
            else:
                v = pltpu.roll(x, shift=(-s) % M, axis=1)  # shifted[m] = x[m + s]
                cols.append(v * mask_ref[t:t + 1, :])
        x_stack = jnp.concatenate(cols, axis=0)            # (KK*C_in, M)

        # Single fused MXU matmul over all taps; pixel dim (M) on the lane side.
        y = jnp.dot(w_ref[...], x_stack,
                    preferred_element_type=jnp.float32)    # (C_out, M)
        y = y + b_ref[...]

        if act_norm:
            # GroupNorm(groups, C_out), biased variance (PyTorch semantics).
            parts = []
            for g in range(groups):
                yg = y[g * Cg:(g + 1) * Cg, :]
                mu = jnp.mean(yg, axis=(0, 1), keepdims=True)
                d = yg - mu
                var = jnp.mean(d * d, axis=(0, 1), keepdims=True)
                parts.append(d * jax.lax.rsqrt(var + eps))
            yn = jnp.concatenate(parts, axis=0) * g_ref[...] + beta_ref[...]
            out = yn * jax.nn.sigmoid(yn)                  # SiLU (sigmoid on EUP)
        else:
            out = y

        o_ref[0] = out.astype(o_ref.dtype)

    return kernel


def convsc_pallas(x_nchw, params, *, kernel_size=3, groups=2, eps=1e-5,
                  act_norm=True):
    """Forward pass of SimVP ConvSC (stride-1 / no-upsampling path)."""
    # TODO(synk): the downsampling (stride=2) and upsampling (Conv2d -> 4*C_out +
    #             nn.PixelShuffle) branches of BasicConv2d are not implemented here.
    # TODO(synk): very large H*W would need spatial tiling + two-pass GroupNorm stats.
    K = kernel_size
    assert K % 2 == 1, "only odd kernel sizes supported"
    P = (K - 1 + 1) // 2          # ConvSC: padding = (kernel_size - stride + 1)//2, stride=1

    x = x_nchw.astype(jnp.float32)
    N, C_in, H, W = x.shape
    M = H * W
    KK = K * K

    w = params["w"].astype(jnp.float32)                    # (C_out, C_in, K, K)
    C_out = w.shape[0]
    assert C_out % groups == 0

    # Conv weight laid out tap-major / input-channel-minor to match x_stack rows.
    w_mat = jnp.transpose(w, (0, 2, 3, 1)).reshape(C_out, KK * C_in)
    b_col = params["b"].reshape(C_out, 1).astype(jnp.float32)
    g_col = params["gamma"].reshape(C_out, 1).astype(jnp.float32)
    beta_col = params["beta"].reshape(C_out, 1).astype(jnp.float32)

    # Precomputed 0/1 border-validity masks (one row per tap), built on host.
    taps = [(ki - P, kj - P) for ki in range(K) for kj in range(K)]
    hh, ww = np.meshgrid(np.arange(H), np.arange(W), indexing="ij")
    mask_np = np.stack([
        ((hh + di >= 0) & (hh + di < H) & (ww + dj >= 0) & (ww + dj < W)).reshape(-1)
        for (di, dj) in taps
    ]).astype(np.float32)                                  # (KK, M)
    masks = jnp.asarray(mask_np)

    x_flat = x.reshape(N, C_in, M)                         # contiguous, free reshape

    kernel = _make_convsc_kernel(H, W, C_in, C_out, K, P, groups, eps, act_norm)

    const2 = lambda n: (0, 0)
    in_specs = [
        pl.BlockSpec((1, C_in, M), lambda n: (n, 0, 0)),   # x (lane-dense: M lanes)
        pl.BlockSpec((KK, M), const2),                     # tap masks
        pl.BlockSpec((C_out, KK * C_in), const2),          # conv weight
        pl.BlockSpec((C_out, 1), const2),                  # conv bias
        pl.BlockSpec((C_out, 1), const2),                  # gamma
        pl.BlockSpec((C_out, 1), const2),                  # beta
    ]
    out_spec = pl.BlockSpec((1, C_out, M), lambda n: (n, 0, 0))  # lane-dense output

    # Explicit scoped-VMEM budget from the computed footprint, with headroom.
    f32 = 4
    io_bytes = 2 * f32 * M * (C_in + C_out)                # double-buffered in/out blocks
    const_bytes = 2 * f32 * (KK * M + C_out * (KK * C_in + 3))
    live_bytes = f32 * M * (KK * C_in + 4 * C_out)         # tap stack + temporaries
    vmem_limit = int(min(96 * 2**20,
                         max(4 * 2**20, 2 * (io_bytes + const_bytes + live_bytes))))

    out_flat = pl.pallas_call(
        kernel,
        out_shape=jax.ShapeDtypeStruct((N, C_out, M), jnp.float32),
        grid_spec=pltpu.PrefetchScalarGridSpec(
            num_scalar_prefetch=0,
            grid=(N,),
            in_specs=in_specs,
            out_specs=out_spec,
        ),
        compiler_params=pltpu.CompilerParams(
            dimension_semantics=("parallel",),   # independent images (v7x: 2 TensorCores)
            vmem_limit_bytes=vmem_limit,
        ),
    )(x_flat, masks, w_mat, b_col, g_col, beta_col)

    return out_flat.reshape(N, C_out, H, W)


def convsc_ref(x_nchw, params, *, kernel_size=3, groups=2, eps=1e-5,
               act_norm=True):
    """Pure-JAX reference mirroring the PyTorch ConvSC forward."""
    K = kernel_size
    P = K // 2
    x = x_nchw.astype(jnp.float32)
    w = params["w"].astype(jnp.float32)
    y = jax.lax.conv_general_dilated(
        x, w, window_strides=(1, 1), padding=((P, P), (P, P)),
        dimension_numbers=("NCHW", "OIHW", "NCHW"))
    y = y + params["b"].reshape(1, -1, 1, 1)
    if not act_norm:
        return y
    N, C, H, W = y.shape
    yg = y.reshape(N, groups, C // groups, H, W)
    mu = jnp.mean(yg, axis=(2, 3, 4), keepdims=True)
    var = jnp.mean(jnp.square(yg - mu), axis=(2, 3, 4), keepdims=True)
    yn = ((yg - mu) / jnp.sqrt(var + eps)).reshape(N, C, H, W)
    yn = yn * params["gamma"].reshape(1, -1, 1, 1) + params["beta"].reshape(1, -1, 1, 1)
    return yn * jax.nn.sigmoid(yn)


if __name__ == "__main__":
    N, C_in, C_out, H, W = 2, 4, 8, 16, 16
    K = 3

    keys = jax.random.split(jax.random.PRNGKey(0), 5)
    params = {
        "w": 0.1 * jax.random.normal(keys[0], (C_out, C_in, K, K), jnp.float32),
        "b": 0.05 * jax.random.normal(keys[1], (C_out,), jnp.float32),
        "gamma": 1.0 + 0.1 * jax.random.normal(keys[2], (C_out,), jnp.float32),
        "beta": 0.05 * jax.random.normal(keys[3], (C_out,), jnp.float32),
    }
    x = jax.random.normal(keys[4], (N, C_in, H, W), dtype=jnp.float32)   # NCHW

    out = jax.block_until_ready(convsc_pallas(x, params, kernel_size=K))
    ref = jax.block_until_ready(convsc_ref(x, params, kernel_size=K))

    np.testing.assert_allclose(np.asarray(out), np.asarray(ref),
                               rtol=1e-3, atol=1e-3)
    print("KERNEL_OK")
</pallas_src>

<mosaic_0001>
module attributes {stable_mosaic.version = 11 : i64} {
  func.func @kernel(%arg0: i32, %arg1: memref<1x4x256xf32, #tpu.memory_space<vmem>>, %arg2: memref<9x256xf32, #tpu.memory_space<vmem>>, %arg3: memref<8x36xf32, #tpu.memory_space<vmem>>, %arg4: memref<8x1xf32, #tpu.memory_space<vmem>>, %arg5: memref<8x1xf32, #tpu.memory_space<vmem>>, %arg6: memref<8x1xf32, #tpu.memory_space<vmem>>, %arg7: memref<1x8x256xf32, #tpu.memory_space<vmem>>) attributes {dimension_semantics = [#tpu.dimension_semantics<parallel>], iteration_bounds = array<i64: 2>, scalar_prefetch = 0 : i64, scratch_operands = 0 : i64, tpu.core_type = #tpu.core_type<tc>, window_params = [{transform_indices = @transform_0, window_bounds = array<i64: 1, 4, 256>}, {pipeline_mode = #tpu.pipeline_mode<synchronous>, transform_indices = @transform_1, window_bounds = array<i64: 9, 256>}, {pipeline_mode = #tpu.pipeline_mode<synchronous>, transform_indices = @transform_2, window_bounds = array<i64: 8, 36>}, {pipeline_mode = #tpu.pipeline_mode<synchronous>, transform_indices = @transform_3, window_bounds = array<i64: 8, 1>}, {pipeline_mode = #tpu.pipeline_mode<synchronous>, transform_indices = @transform_4, window_bounds = array<i64: 8, 1>}, {pipeline_mode = #tpu.pipeline_mode<synchronous>, transform_indices = @transform_5, window_bounds = array<i64: 8, 1>}, {transform_indices = @transform_6, window_bounds = array<i64: 1, 8, 256>}]} {
    %c0 = arith.constant 0 : index
    %c0_0 = arith.constant 0 : index
    %c0_1 = arith.constant 0 : index
    %0 = vector.load %arg1[%c0, %c0_0, %c0_1] : memref<1x4x256xf32, #tpu.memory_space<vmem>>, vector<1x4x256xf32>
    %1 = vector.shape_cast %0 : vector<1x4x256xf32> to vector<4x256xf32>
    %c17_i32 = arith.constant 17 : i32
    %2 = tpu.dynamic_rotate %1 by %c17_i32 dim 1 : vector<4x256xf32>, i32 -> vector<4x256xf32>
    %c0_2 = arith.constant 0 : index
    %c0_3 = arith.constant 0 : index
    %3 = vector.load %arg2[%c0_2, %c0_3] : memref<9x256xf32, #tpu.memory_space<vmem>>, vector<1x256xf32>
    %4 = vector.broadcast %3 : vector<1x256xf32> to vector<4x256xf32>
    %5 = arith.mulf %2, %4 : vector<4x256xf32>
    %c16_i32 = arith.constant 16 : i32
    %6 = tpu.dynamic_rotate %1 by %c16_i32 dim 1 : vector<4x256xf32>, i32 -> vector<4x256xf32>
    %c1 = arith.constant 1 : index
    %c0_4 = arith.constant 0 : index
    %7 = vector.load %arg2[%c1, %c0_4] : memref<9x256xf32, #tpu.memory_space<vmem>>, vector<1x256xf32>
    %8 = vector.broadcast %7 : vector<1x256xf32> to vector<4x256xf32>
    %9 = arith.mulf %6, %8 : vector<4x256xf32>
    %c15_i32 = arith.constant 15 : i32
    %10 = tpu.dynamic_rotate %1 by %c15_i32 dim 1 : vector<4x256xf32>, i32 -> vector<4x256xf32>
    %c2 = arith.constant 2 : index
    %c0_5 = arith.constant 0 : index
    %11 = vector.load %arg2[%c2, %c0_5] : memref<9x256xf32, #tpu.memory_space<vmem>>, vector<1x256xf32>
    %12 = vector.broadcast %11 : vector<1x256xf32> to vector<4x256xf32>
    %13 = arith.mulf %10, %12 : vector<4x256xf32>
    %c1_i32 = arith.constant 1 : i32
    %14 = tpu.dynamic_rotate %1 by %c1_i32 dim 1 : vector<4x256xf32>, i32 -> vector<4x256xf32>
    %c3 = arith.constant 3 : index
    %c0_6 = arith.constant 0 : index
    %15 = vector.load %arg2[%c3, %c0_6] : memref<9x256xf32, #tpu.memory_space<vmem>>, vector<1x256xf32>
    %16 = vector.broadcast %15 : vector<1x256xf32> to vector<4x256xf32>
    %17 = arith.mulf %14, %16 : vector<4x256xf32>
    %c255_i32 = arith.constant 255 : i32
    %18 = tpu.dynamic_rotate %1 by %c255_i32 dim 1 : vector<4x256xf32>, i32 -> vector<4x256xf32>
    %c5 = arith.constant 5 : index
    %c0_7 = arith.constant 0 : index
    %19 = vector.load %arg2[%c5, %c0_7] : memref<9x256xf32, #tpu.memory_space<vmem>>, vector<1x256xf32>
    %20 = vector.broadcast %19 : vector<1x256xf32> to vector<4x256xf32>
    %21 = arith.mulf %18, %20 : vector<4x256xf32>
    %c241_i32 = arith.constant 241 : i32
    %22 = tpu.dynamic_rotate %1 by %c241_i32 dim 1 : vector<4x256xf32>, i32 -> vector<4x256xf32>
    %c6 = arith.constant 6 : index
    %c0_8 = arith.constant 0 : index
    %23 = vector.load %arg2[%c6, %c0_8] : memref<9x256xf32, #tpu.memory_space<vmem>>, vector<1x256xf32>
    %24 = vector.broadcast %23 : vector<1x256xf32> to vector<4x256xf32>
    %25 = arith.mulf %22, %24 : vector<4x256xf32>
    %c240_i32 = arith.constant 240 : i32
    %26 = tpu.dynamic_rotate %1 by %c240_i32 dim 1 : vector<4x256xf32>, i32 -> vector<4x256xf32>
    %c7 = arith.constant 7 : index
    %c0_9 = arith.constant 0 : index
    %27 = vector.load %arg2[%c7, %c0_9] : memref<9x256xf32, #tpu.memory_space<vmem>>, vector<1x256xf32>
    %28 = vector.broadcast %27 : vector<1x256xf32> to vector<4x256xf32>
    %29 = arith.mulf %26, %28 : vector<4x256xf32>
    %c239_i32 = arith.constant 239 : i32
    %30 = tpu.dynamic_rotate %1 by %c239_i32 dim 1 : vector<4x256xf32>, i32 -> vector<4x256xf32>
    %c8 = arith.constant 8 : index
    %c0_10 = arith.constant 0 : index
    %31 = vector.load %arg2[%c8, %c0_10] : memref<9x256xf32, #tpu.memory_space<vmem>>, vector<1x256xf32>
    %32 = vector.broadcast %31 : vector<1x256xf32> to vector<4x256xf32>
    %33 = arith.mulf %30, %32 : vector<4x256xf32>
    %34 = tpu.concatenate %5, %9, %13, %17, %1, %21, %25, %29, %33 in 0 : vector<4x256xf32>, vector<4x256xf32>, vector<4x256xf32>, vector<4x256xf32>, vector<4x256xf32>, vector<4x256xf32>, vector<4x256xf32>, vector<4x256xf32>, vector<4x256xf32> -> vector<36x256xf32>
    %c0_11 = arith.constant 0 : index
    %c0_12 = arith.constant 0 : index
    %35 = vector.load %arg3[%c0_11, %c0_12] : memref<8x36xf32, #tpu.memory_space<vmem>>, vector<8x36xf32>
    %cst = arith.constant dense<0.000000e+00> : vector<8x256xf32>
    %36 = tpu.matmul %35, %34, %cst {dimension_numbers = #tpu.dot_dimension_numbers<[1], [0], [0], [1], [0, 0, 1, 1], [], []>} : vector<8x36xf32>, vector<36x256xf32>, vector<8x256xf32> -> vector<8x256xf32>
    %c0_13 = arith.constant 0 : index
    %c0_14 = arith.constant 0 : index
    %37 = vector.load %arg4[%c0_13, %c0_14] : memref<8x1xf32, #tpu.memory_space<vmem>>, vector<8x1xf32>
    %38 = vector.broadcast %37 : vector<8x1xf32> to vector<8x256xf32>
    %39 = arith.addf %36, %38 : vector<8x256xf32>
    %40 = vector.extract_strided_slice %39 {offsets = [0, 0], sizes = [4, 256], strides = [1, 1]} : vector<8x256xf32> to vector<4x256xf32>
    %41 = vector.shape_cast %40 : vector<4x256xf32> to vector<1x4x256xf32>
    %cst_15 = arith.constant dense<0.000000e+00> : vector<1xf32>
    %42 = vector.multi_reduction <add>, %41, %cst_15 [1, 2] : vector<1x4x256xf32> to vector<1xf32>
    %43 = vector.shape_cast %42 : vector<1xf32> to vector<1x1x1xf32>
    %44 = vector.extract %43[0, 0, 0] : f32 from vector<1x1x1xf32>
    %45 = vector.broadcast %44 : f32 to vector<1x1xf32>
    %cst_16 = arith.constant 1.024000e+03 : f32
    %46 = vector.broadcast %cst_16 : f32 to vector<1x1xf32>
    %47 = arith.divf %45, %46 : vector<1x1xf32>
    %48 = vector.broadcast %47 : vector<1x1xf32> to vector<4x256xf32>
    %49 = arith.subf %40, %48 : vector<4x256xf32>
    %50 = arith.mulf %49, %49 : vector<4x256xf32>
    %51 = vector.shape_cast %50 : vector<4x256xf32> to vector<1x4x256xf32>
    %cst_17 = arith.constant dense<0.000000e+00> : vector<1xf32>
    %52 = vector.multi_reduction <add>, %51, %cst_17 [1, 2] : vector<1x4x256xf32> to vector<1xf32>
    %53 = vector.shape_cast %52 : vector<1xf32> to vector<1x1x1xf32>
    %54 = vector.extract %53[0, 0, 0] : f32 from vector<1x1x1xf32>
    %55 = vector.broadcast %54 : f32 to vector<1x1xf32>
    %cst_18 = arith.constant 1.024000e+03 : f32
    %56 = vector.broadcast %cst_18 : f32 to vector<1x1xf32>
    %57 = arith.divf %55, %56 : vector<1x1xf32>
    %cst_19 = arith.constant 9.99999974E-6 : f32
    %58 = vector.broadcast %cst_19 : f32 to vector<1x1xf32>
    %59 = arith.addf %57, %58 : vector<1x1xf32>
    %60 = math.rsqrt %59 : vector<1x1xf32>
    %61 = vector.broadcast %60 : vector<1x1xf32> to vector<4x256xf32>
    %62 = arith.mulf %49, %61 : vector<4x256xf32>
    %63 = vector.extract_strided_slice %39 {offsets = [4, 0], sizes = [4, 256], strides = [1, 1]} : vector<8x256xf32> to vector<4x256xf32>
    %64 = vector.shape_cast %63 : vector<4x256xf32> to vector<1x4x256xf32>
    %cst_20 = arith.constant dense<0.000000e+00> : vector<1xf32>
    %65 = vector.multi_reduction <add>, %64, %cst_20 [1, 2] : vector<1x4x256xf32> to vector<1xf32>
    %66 = vector.shape_cast %65 : vector<1xf32> to vector<1x1x1xf32>
    %67 = vector.extract %66[0, 0, 0] : f32 from vector<1x1x1xf32>
    %68 = vector.broadcast %67 : f32 to vector<1x1xf32>
    %cst_21 = arith.constant 1.024000e+03 : f32
    %69 = vector.broadcast %cst_21 : f32 to vector<1x1xf32>
    %70 = arith.divf %68, %69 : vector<1x1xf32>
    %71 = vector.broadcast %70 : vector<1x1xf32> to vector<4x256xf32>
    %72 = arith.subf %63, %71 : vector<4x256xf32>
    %73 = arith.mulf %72, %72 : vector<4x256xf32>
    %74 = vector.shape_cast %73 : vector<4x256xf32> to vector<1x4x256xf32>
    %cst_22 = arith.constant dense<0.000000e+00> : vector<1xf32>
    %75 = vector.multi_reduction <add>, %74, %cst_22 [1, 2] : vector<1x4x256xf32> to vector<1xf32>
    %76 = vector.shape_cast %75 : vector<1xf32> to vector<1x1x1xf32>
    %77 = vector.extract %76[0, 0, 0] : f32 from vector<1x1x1xf32>
    %78 = vector.broadcast %77 : f32 to vector<1x1xf32>
    %cst_23 = arith.constant 1.024000e+03 : f32
    %79 = vector.broadcast %cst_23 : f32 to vector<1x1xf32>
    %80 = arith.divf %78, %79 : vector<1x1xf32>
    %cst_24 = arith.constant 9.99999974E-6 : f32
    %81 = vector.broadcast %cst_24 : f32 to vector<1x1xf32>
    %82 = arith.addf %80, %81 : vector<1x1xf32>
    %83 = math.rsqrt %82 : vector<1x1xf32>
    %84 = vector.broadcast %83 : vector<1x1xf32> to vector<4x256xf32>
    %85 = arith.mulf %72, %84 : vector<4x256xf32>
    %86 = tpu.concatenate %62, %85 in 0 : vector<4x256xf32>, vector<4x256xf32> -> vector<8x256xf32>
    %c0_25 = arith.constant 0 : index
    %c0_26 = arith.constant 0 : index
    %87 = vector.load %arg5[%c0_25, %c0_26] : memref<8x1xf32, #tpu.memory_space<vmem>>, vector<8x1xf32>
    %88 = vector.broadcast %87 : vector<8x1xf32> to vector<8x256xf32>
    %89 = arith.mulf %86, %88 : vector<8x256xf32>
    %c0_27 = arith.constant 0 : index
    %c0_28 = arith.constant 0 : index
    %90 = vector.load %arg6[%c0_27, %c0_28] : memref<8x1xf32, #tpu.memory_space<vmem>>, vector<8x1xf32>
    %91 = vector.broadcast %90 : vector<8x1xf32> to vector<8x256xf32>
    %92 = arith.addf %89, %91 : vector<8x256xf32>
    %93 = arith.negf %92 : vector<8x256xf32>
    %94 = math.exp %93 : vector<8x256xf32>
    %cst_29 = arith.constant 1.000000e+00 : f32
    %95 = vector.broadcast %cst_29 : f32 to vector<8x256xf32>
    %96 = arith.addf %95, %94 : vector<8x256xf32>
    %97 = arith.divf %95, %96 : vector<8x256xf32>
    %98 = arith.mulf %92, %97 : vector<8x256xf32>
    %c0_30 = arith.constant 0 : index
    %c0_31 = arith.constant 0 : index
    %c0_32 = arith.constant 0 : index
    %99 = vector.load %arg7[%c0_30, %c0_31, %c0_32] : memref<1x8x256xf32, #tpu.memory_space<vmem>>, vector<1x8x256xf32>
    %100 = vector.shape_cast %99 : vector<1x8x256xf32> to vector<8x256xf32>
    %101 = vector.shape_cast %98 : vector<8x256xf32> to vector<1x8x256xf32>
    tpu.vector_store %arg7[%c0_30, %c0_31, %c0_32], %101 {strides = array<i32>} : memref<1x8x256xf32, #tpu.memory_space<vmem>>, vector<1x8x256xf32>,
    return
  }
  func.func @transform_0(%arg0: i32) -> (i32, i32, i32) {
    %c0_i32 = arith.constant 0 : i32
    %c0_i32_0 = arith.constant 0 : i32
    %c0_i32_1 = arith.constant 0 : i32
    return %arg0, %c0_i32, %c0_i32_0 : i32, i32, i32
  }
  func.func @transform_1(%arg0: i32) -> (i32, i32) {
    %c0_i32 = arith.constant 0 : i32
    %c0_i32_0 = arith.constant 0 : i32
    %c0_i32_1 = arith.constant 0 : i32
    return %c0_i32, %c0_i32_0 : i32, i32
  }
  func.func @transform_2(%arg0: i32) -> (i32, i32) {
    %c0_i32 = arith.constant 0 : i32
    %c0_i32_0 = arith.constant 0 : i32
    %c0_i32_1 = arith.constant 0 : i32
    return %c0_i32, %c0_i32_0 : i32, i32
  }
  func.func @transform_3(%arg0: i32) -> (i32, i32) {
    %c0_i32 = arith.constant 0 : i32
    %c0_i32_0 = arith.constant 0 : i32
    %c0_i32_1 = arith.constant 0 : i32
    return %c0_i32, %c0_i32_0 : i32, i32
  }
  func.func @transform_4(%arg0: i32) -> (i32, i32) {
    %c0_i32 = arith.constant 0 : i32
    %c0_i32_0 = arith.constant 0 : i32
    %c0_i32_1 = arith.constant 0 : i32
    return %c0_i32, %c0_i32_0 : i32, i32
  }
  func.func @transform_5(%arg0: i32) -> (i32, i32) {
    %c0_i32 = arith.constant 0 : i32
    %c0_i32_0 = arith.constant 0 : i32
    %c0_i32_1 = arith.constant 0 : i32
    return %c0_i32, %c0_i32_0 : i32, i32
  }
  func.func @transform_6(%arg0: i32) -> (i32, i32, i32) {
    %c0_i32 = arith.constant 0 : i32
    %c0_i32_0 = arith.constant 0 : i32
    %c0_i32_1 = arith.constant 0 : i32
    return %arg0, %c0_i32, %c0_i32_0 : i32, i32, i32
  }
}

</mosaic_0001>

<bundles_post_ra>
// kernel: tpu_custom_call.1
= control target key start
LH: loop header
LB: loop body
LE: loop exit
PB: predicated region body
PF: predicated region fallthrough
CT: control target
= control target key end

     0   :  { %11 = vsyncpa [#allocation3], 0  ;;  %s1260_s0 = inlined_call_operand.vmem [shape: f32[2,4,256], index: 0, kind: input, shape index: {}]   ;;  %s1261_s1 = inlined_call_operand.hbm [shape: f32[9,256], index: 1, kind: input, shape index: {}]   ;;  %s1262_s2 = inlined_call_operand.vmem [shape: f32[8,36], index: 2, kind: input, shape index: {}]   ;;  %s1263_s3 = inlined_call_operand.vmem [shape: f32[8,1], index: 3, kind: input, shape index: {}]   ;;  %s1264_s4 = inlined_call_operand.vmem [shape: f32[8,1], index: 4, kind: input, shape index: {}]   ;;  %s1265_s5 = inlined_call_operand.vmem [shape: f32[8,1], index: 5, kind: input, shape index: {}]   ;;  %s1266_s6 = inlined_call_operand.hbm [shape: f32[2,8,256], index: 6, kind: output, shape index: {}]  }
   0x1   :  { %12 = vsyncpa [#allocation4], 0 }
   0x2   :  { %14 = vsyncpa [#allocation4 + $0x1], 0  ;;  %s1031_s21 = smov 0   ;;  %s1033_s22 = smov 0  }
   0x3   :  { %s1035_s23 = smov 0   ;;  %s1037_s24 = smov 0  }
   0x4 LB: > { %s1052_s25 = sadd.s32 4294967295, %s980_s24   ;;  %s772_s26 = sadd.s32 4294967294, %s980_s24   ;;  %s980_s24 = sphi %s1037_s24, %s1282_s24   ;;  %s976_s23 = sphi %s1035_s23, %s1281_s23   ;;  %s972_s22 = sphi %s1033_s22, %s1280_s22   ;;  %s968_s21 = sphi %s1031_s21, %s1279_s21  }
   0x5   : > { %s1056_s27 = sadd.s32 1, %s980_s24   ;;  %s158_s28 = sadd.s32 1, %s976_s23 }
   0x6   : > { %s155_s29 = ssub.s32 %s980_s24, %s1056_s27  ;;  %p168_p0 = scmp.ne.s32.totalorder %s976_s23, %s972_s22 }
   0x7   : > { %p156_p1 = scmp.eq.s32.totalorder %s155_s29, 0  ;;  %p169_p2 = scmp.eq.s32.totalorder %s1052_s25, 1 }
   0x8   : > { %p174_p3 = scmp.ne.s32.totalorder %s972_s22, %s968_s21  ;;  %p175_p4 = scmp.eq.s32.totalorder %s772_s26, 1 }
   0x9   : > { %s1067_s30 = scalar_select %p156_p1, %s976_s23, %s158_s28  }
   0xa   : > { %p1069_p5 = por %p169_p2, %p168_p0  ;;  %p1073_p6 = por %p175_p4, %p174_p3 }
   0xb   : > { %p773_p7 = scmp.ge.s32.totalorder %s980_s24, 1  ;;  %p182_p8 = scmp.lt.s32.totalorder %s980_s24, 3 }
   0xc   : > { %s1270_s7 = scalar_select %p1069_p5, 1, 0 }
   0xd   : > { %s1271_s8 = scalar_select %p1073_p6, 1, 0 }
   0xe   : > { %p1267_p9 = scmp.eq.s32.totalorder %s1052_s25, 0  ;;  %p1080_p10 = pnand %p773_p7, %p182_p8 }
   0xf   : > { %s982_s10 = smov [#allocation2]   ;;  %s886_s15 = scalar_lea.hbm %s1261_s1, 512 }
  0x10   : > { %s1272_s9 = scalar_select %p1080_p10, 1, 0 }
  0x11   : > { %s194_s11 = sshll.u32 %s982_s10, 4  ;;  %p815_p11 = pneg %p1080_p10  ;;  %s195_s11 = int_to_ptr.vmem [resolvable:$true] %s194_s11 }
  0x12   : > { %p887_p13 = scmp.ne.s32.totalorder %s1261_s1, %s886_s15  ;;  %p893_p3 = scmp.lt.u32.totalorder %s886_s15, %s1261_s1 }
  0x13   : > { %p1088_p12 = pnand %p1267_p9, %p815_p11 }
  0x15   : > { %p888_p0 = pneg %p1088_p12 }
  0x17   : > { %p889_p1 = pnand %p888_p0, %p887_p13 }
  0x19   : > { %p890_p2 = pneg %p889_p1 }
  0x1b   : > { %p895_p4 = pnand %p893_p3, %p890_p2 }
  0x1d   : > { %898 = shalt.err (!%p895_p4)
}
  0x1e   : > { %s899_s20 = scalar_lea.vmem %s195_s11, 512  ;;  %p907_p9 = scmp.lt.s32.totalorder %s195_s11, %s195_s11 }
  0x1f   : > { %p900_p7 = scmp.ne.s32.totalorder %s195_s11, %s899_s20  ;;  %p908_p6 = scmp.lt.s32.totalorder %s899_s20, %s899_s20 }
  0x21   : > { %p902_p8 = pnand %p900_p7, %p888_p0  ;;  %p909_p5 = por %p908_p6, %p907_p9 }
  0x23   : > { %p903_p11 = pneg %p902_p8 }
  0x25   : > { %p910_p10 = pnand %p909_p5, %p903_p11 }
  0x27   : > { %913 = shalt.err (!%p910_p10)
}
  0x28   : > { %s983_s26 = smov 256   ;;  %s984_s28 = smov 16  }
  0x29   : > { %818 = dma.hbm_to_vmem [thread:$0]  (!%p1088_p12), %s1261_s1, 512, %s195_s11, [#allocation3], %s983_s26, %s983_s26, %s984_s28  }
  0x2a   : > { %p1274_p13 = scmp.ne.s32.totalorder %s1272_s9, 0 }
  0x2b   : > { %p1275_p1 = scmp.eq.s32.totalorder (!%p1274_p13), %s1052_s25, 0 }
  0x2c   : > { %230 = sbr.rel (%p1274_p13) target bundleno = 1129 (0x469), region = 44 }
  0x33   : > { %959 = dma.done.wait (%p1275_p1), [#allocation3], 512   ;;  %p1276_p0 = pmov %p1275_p1 }
  0x34   : > { %p260_p5 = scmp.lt.s32.totalorder %s1052_s25, 1  ;;  %s985_s11 = smov 1   ;;  %v991_v2 = vmov 0.0   ;;  %v993_v3 = vmov 0   ;;  %v480_v4 = vld [vmem:[%s1263_s3] sm:$0xff]  ;;  %v273_v5 = vlaneseq  ;;  %vm470_vm4 = vcmask 1043456  }
  0x35   : > { %961 = vsyncadd (%p1276_p0), [#allocation3], 4294966784  ;;  %s986_s9 = smov 16   ;;  %s987_s17 = smov 17   ;;  %560 = vmatprep.mubr.f32.mxu0 %v991_v2  ;;  %871 = vset.pattern.permute.xlu0 %v993_v3  ;;  %vm486_vm9 = vcmask 293888  }
  0x36   : > { %s261_s13 = scalar_select %p260_p5, %s1052_s25, 1  ;;  %872 = vset.pattern.permute.xlu1 %v993_v3  ;;  %v281_v6 = vshrl.u32 %v273_v5, 7  ;;  %v1144_v7 = vand.u32 127, %v273_v5  ;;  %v344_v12 = vld [vmem:[#allocation2 + $0x3] ss:$8 sm:$0x3] }
  0x37   : > { %s988_s18 = smov 15   ;;  %s989_s19 = smov 127   ;;  %v300_v13 = vld [vmem:[#allocation2 + $0x1] ss:$8 sm:$0x3] }
  0x38   : > { %s791_s14 = sshll.u32 %s261_s13, 3  ;;  %s990_s20 = smov 112   ;;  %v1146_v10 = vsub.s32 0, %v281_v6  ;;  %v1148_v11 = vsub.s32 1, %v281_v6  ;;  %vm340_vm0 = vcmp.lt.s32.totalorder %v1144_v7, 1  ;;  %vm296_vm1 = vcmp.lt.s32.totalorder %v1144_v7, 16 }
  0x39   : > { %s264_s16 = scalar_lea.vmem %s1260_s0, %s791_s14  ;;  %s992_s26 = smov 113   ;;  %v278_v18 = vld [vmem:[#allocation2] ss:$8 sm:$0x3]  ;;  %vm275_vm2 = vcmp.lt.s32.totalorder %v1144_v7, 17  ;;  %vm318_vm3 = vcmp.lt.s32.totalorder %v1144_v7, 15 }
  0x3a   : > { %v1119_v0 = vld [vmem:[%s264_s16] sm:$0xff]  ;;  %s994_s28 = smov 111   ;;  %v349_v16 = vrot.slane %v344_v12, %v1146_v10  ;;  %v353_v17 = vrot.slane %v344_v12, %v1148_v11  ;;  %v305_v21 = vrot.slane %v300_v13, %v1146_v10  ;;  %v309_v22 = vrot.slane %v300_v13, %v1148_v11  ;;  %p1277_p9 = scmp.ne.s32.totalorder %s1270_s7, 0 }
  0x3b   : > { %336 = vrot.lane.b32.xlu1 %v1119_v0, %s985_s11  ;;  %292 = vrot.lane.b32.xlu0 %v1119_v0, %s986_s9  ;;  %v1125_v1 = vcombine.high %v1119_v0, %v1119_v0  ;;  %v322_v23 = vld [vmem:[#allocation2 + $0x2] ss:$8 sm:$0x3]  ;;  %v283_v24 = vrot.slane %v278_v18, %v1146_v10  ;;  %v287_v25 = vrot.slane %v278_v18, %v1148_v11  ;;  %vm362_vm5 = vcmp.lt.s32.totalorder %v1144_v7, 127  ;;  %s995_s16 = smov [#allocation5]  }
  0x3c   : > { %v327_v34 = vrot.slane %v322_v23, %v1146_v10  ;;  %v331_v35 = vrot.slane %v322_v23, %v1148_v11  ;;  %v366_v42 = vld [vmem:[#allocation2 + $0x5] ss:$8 sm:$0x3]  ;;  %v410_v53 = vld [vmem:[#allocation2 + $0x7] ss:$8 sm:$0x3] }
  0x3d   : > { %v371_v51 = vrot.slane %v366_v42, %v1146_v10  ;;  %v375_v52 = vrot.slane %v366_v42, %v1148_v11  ;;  %vm406_vm6 = vcmp.lt.s32.totalorder %v1144_v7, 112  ;;  %v415_v2 = vrot.slane %v410_v53, %v1146_v10  ;;  %v432_v18 = vld [vmem:[#allocation2 + $0x10] ss:$8 sm:$0x3] }
  0x3e   : > { %v419_v3 = vrot.slane %v410_v53, %v1148_v11  ;;  %vm384_vm7 = vcmp.lt.s32.totalorder %v1144_v7, 113  ;;  %vm428_vm8 = vcmp.lt.s32.totalorder %v1144_v7, 111 }
  0x3f   : > { %269 = vrot.lane.b32.xlu0 %v1119_v0, %s987_s17  ;;  %338 = vrot.lane.b32.xlu1 %v1125_v1, %s985_s11 }
  0x43   : > { %271 = vrot.lane.b32.xlu1 %v1125_v1, %s987_s17  ;;  %294 = vrot.lane.b32.xlu0 %v1125_v1, %s986_s9 }
  0x47   : > { %316 = vrot.lane.b32.xlu1 %v1125_v1, %s988_s18  ;;  %314 = vrot.lane.b32.xlu0 %v1119_v0, %s988_s18 }
  0x4b   : > { %360 = vrot.lane.b32.xlu1 %v1125_v1, %s989_s19  ;;  %358 = vrot.lane.b32.xlu0 %v1119_v0, %s989_s19 }
  0x4f   : > { %404 = vrot.lane.b32.xlu1 %v1125_v1, %s990_s20  ;;  %402 = vrot.lane.b32.xlu0 %v1119_v0, %s990_s20  ;;  %s257_s20 = sand.u32 1, %s972_s22  }
  0x50   : > { %s687_s12 = scalar_lea.sflag [#allocation4], %s257_s20 }
  0x53   : > { %382 = vrot.lane.b32.xlu1 %v1125_v1, %s992_s26  ;;  %380 = vrot.lane.b32.xlu0 %v1119_v0, %s992_s26  ;;  %s778_s26 = sshll.u32 %s257_s20, 4 }
  0x54   : > { %s259_s29 = scalar_lea.vmem [#allocation5], %s778_s26 }
  0x55   : > { %s701_s10 = sshll.u32 %s259_s29, 4  ;;  %s1220_s10 = int_to_ptr.vmem [resolvable:$true] %s701_s10 }
  0x57   : > { %426 = vrot.lane.b32.xlu1 %v1125_v1, %s994_s28  ;;  %424 = vrot.lane.b32.xlu0 %v1119_v0, %s994_s28  ;;  %s792_s28 = sshll.u32 %s1052_s25, 8  ;;  %s914_s25 = scalar_lea.vmem %s1220_s10, 256 }
  0x58   : > { %p915_p6 = scmp.ne.s32.totalorder %s1220_s10, %s914_s25 }
  0x5a   : > { %p916_p10 = pnand %p915_p6, %p1277_p9 }
  0x5b   : > { %483 = vperm.xlu0 %871, %v480_v4   ;;  %v388_v4 = vld [vmem:[#allocation2 + $0x6] ss:$8 sm:$0x3] }
  0x5c   : > { %p917_p12 = pneg %p916_p10 }
  0xad   : > { %v337_v8 = vpop.permute.xlu1 %336  ;;  %v293_v9 = vpop.permute.xlu0 %292 }
  0xb1   : > { %v270_v14 = vpop.permute.xlu0 %269  ;;  %v339_v15 = vpop.permute.xlu1 %338 }
  0xb2   : > { %v341_v19 = vsel %vm340_vm0, %v337_v8, %v339_v15  ;;  %v342_v20 = vsel %vm340_vm0, %v339_v15, %v337_v8 }
  0xb3   : > { %v356_v28 = vmul.f32 %v349_v16, %v342_v20  ;;  %v357_v29 = vmul.f32 %v353_v17, %v341_v19  ;;  %v393_v16 = vrot.slane %v388_v4, %v1146_v10  ;;  %v397_v17 = vrot.slane %v388_v4, %v1148_v11 }
  0xb5   : > { %v272_v26 = vpop.permute.xlu1 %271  ;;  %v295_v27 = vpop.permute.xlu0 %294  ;;  %v454_v43 = vrot.slane %v356_v28, 4  ;;  %v455_v44 = vrot.slane %v357_v29, 4 }
  0xb6   : > { %v297_v30 = vsel %vm296_vm1, %v293_v9, %v295_v27  ;;  %v298_v31 = vsel %vm296_vm1, %v295_v27, %v293_v9  ;;  %v276_v36 = vsel %vm275_vm2, %v270_v14, %v272_v26  ;;  %v277_v37 = vsel %vm275_vm2, %v272_v26, %v270_v14 }
  0xb7   : > { %v312_v32 = vmul.f32 %v305_v21, %v298_v31  ;;  %v313_v33 = vmul.f32 %v309_v22, %v297_v30  ;;  %v290_v47 = vmul.f32 %v283_v24, %v277_v37  ;;  %v291_v48 = vmul.f32 %v287_v25, %v276_v36 }
  0xb8   : > { %v441_v25 = vrot.slane %v432_v18, %v1148_v11  ;;  %v437_v30 = vrot.slane %v432_v18, %v1146_v10 }
  0xb9   : > { %v448_v38 = vrot.slane %v312_v32, 4  ;;  %v449_v39 = vrot.slane %v313_v33, 4  ;;  %v317_v40 = vpop.permute.xlu1 %316  ;;  %v315_v41 = vpop.permute.xlu0 %314 }
  0xba   : > { %v319_v45 = vsel %vm318_vm3, %v315_v41, %v317_v40  ;;  %v320_v46 = vsel %vm318_vm3, %v317_v40, %v315_v41 }
  0xbb   : > { %v334_v49 = vmul.f32 %v327_v34, %v320_v46  ;;  %v335_v50 = vmul.f32 %v331_v35, %v319_v45  ;;  %v472_v56 = vsel %vm470_vm4, %v291_v48, %v449_v39  ;;  %v471_v58 = vsel %vm470_vm4, %v290_v47, %v448_v38 }
  0xbd   : > { %v361_v54 = vpop.permute.xlu1 %360  ;;  %v359_v55 = vpop.permute.xlu0 %358  ;;  %v474_v57 = vsel %vm470_vm4, %v335_v50, %v455_v44  ;;  %v473_v59 = vsel %vm470_vm4, %v334_v49, %v454_v43 }
  0xbe   : > { %v363_v60 = vsel %vm362_vm5, %v359_v55, %v361_v54  ;;  %v364_v61 = vsel %vm362_vm5, %v361_v54, %v359_v55  ;;  %v793_v62 = vpack.c.bf16 %v474_v57, %v472_v56  ;;  %v795_v63 = vpack.c.bf16 %v473_v59, %v471_v58 }
  0xbf   : > { %v378_v5 = vmul.f32 %v371_v51, %v363_v60  ;;  %v379_v6 = vmul.f32 %v375_v52, %v364_v61 }
  0xc0   : > { %794 = vmatprep.subr.bf16.mxu0 %v793_v62 }
  0xc1   : > { %v405_v8 = vpop.permute.xlu1 %404  ;;  %796 = vmatpush1.bf16.msra.mxu0 %v795_v63  ;;  %v403_v9 = vpop.permute.xlu0 %402  ;;  %v460_v19 = vrot.slane %v378_v5, 4  ;;  %v461_v20 = vrot.slane %v379_v6, 4  ;;  %v654_v6 = vld [vmem:[%s1264_s4] sm:$0xff] }
  0xc2   : > { %v407_v12 = vsel %vm406_vm6, %v403_v9, %v405_v8  ;;  %v408_v13 = vsel %vm406_vm6, %v405_v8, %v403_v9 }
  0xc3   : > { %v422_v14 = vmul.f32 %v415_v2, %v407_v12  ;;  %v423_v15 = vmul.f32 %v419_v3, %v408_v13  ;;  %v476_v32 = vsel %vm470_vm4, %v1125_v1, %v461_v20  ;;  %v475_v35 = vsel %vm470_vm4, %v1119_v0, %v460_v19  ;;  %v479_v1 = vld [vmem:[%s1262_s2] sm:$0xff] }
  0xc5   : > { %v383_v21 = vpop.permute.xlu1 %382  ;;  %v381_v22 = vpop.permute.xlu0 %380  ;;  %v466_v26 = vrot.slane %v422_v14, 4  ;;  %v467_v27 = vrot.slane %v423_v15, 4 }
  0xc6   : > { %v385_v23 = vsel %vm384_vm7, %v381_v22, %v383_v21  ;;  %v386_v24 = vsel %vm384_vm7, %v383_v21, %v381_v22 }
  0xc7   : > { %v400_v28 = vmul.f32 %v393_v16, %v385_v23  ;;  %v401_v29 = vmul.f32 %v397_v17, %v386_v24 }
  0xc9   : > { %v427_v31 = vpop.permute.xlu1 %426  ;;  %v478_v33 = vsel %vm470_vm4, %v401_v29, %v467_v27  ;;  %v425_v34 = vpop.permute.xlu0 %424  ;;  %v477_v7 = vsel %vm470_vm4, %v400_v28, %v466_v26 }
  0xca   : > { %v797_v36 = vpack.c.bf16 %v478_v33, %v476_v32  ;;  %v429_v11 = vsel %vm428_vm8, %v425_v34, %v427_v31  ;;  %v430_v37 = vsel %vm428_vm8, %v427_v31, %v425_v34  ;;  %v799_v38 = vpack.c.bf16 %v477_v7, %v475_v35  ;;  %v662_v35 = vld [vmem:[%s1265_s5] sm:$0xff] }
  0xcb   : > { %v445_v39 = vmul.f32 %v441_v25, %v430_v37  ;;  %v444_v40 = vmul.f32 %v437_v30, %v429_v11 }
  0xcc   : > { %798 = vmatprep.subr.bf16.mxu0 %v797_v36 }
  0xcd   : > { %800 = vmatpush1.bf16.msra.mxu0 %v799_v38 }
  0xce   : > { %781 = vmatprep.subr.msk.mxu0 %vm470_vm4, %v445_v39 }
  0xd1   : > { %782 = vmatpush1.msk.msra.mxu0 %vm470_vm4, %v444_v40 }
  0xd2   : > { %783 = vmatmul.mubr.msk.f32.vlgmr.msra.gmra.mrb[0].mxu0 %vm486_vm9, %v479_v1 }
  0xda   : > { %v484_v0 = vpop.permute.xlu0 %483 }
 0x1a5   : > { %v562_v10 = vpop.f32.mrb[0].mxu0 }
 0x1a6   : > { %v563_v41 = vadd.f32 %v562_v10, %v484_v0  ;;  %v564_v42 = vpop.f32.mrb[1].mxu0 }
 0x1a7   : > { %v565_v43 = vadd.f32 %v564_v42, %v484_v0 }
 0x1a8   : > { %v567_v44 = vsel %vm470_vm4, %v563_v41, 0.0  ;;  %v606_v45 = vrot.slane %v563_v41, 4 }
 0x1a9   : > { %v568_v46 = vsel %vm470_vm4, %v565_v43, 0.0  ;;  %v607_v47 = vrot.slane %v565_v43, 4 }
 0x1aa   : > { %v569_v48 = vadd.f32 %v568_v46, %v567_v44  ;;  %v610_v49 = vsel %vm470_vm4, %v606_v45, 0.0 }
 0x1ab   : > { %v611_v50 = vsel %vm470_vm4, %v607_v47, 0.0 }
 0x1ac   : > { %570 = vadd.xlane.f32.xlu1 %v569_v48  ;;  %v612_v51 = vadd.f32 %v611_v50, %v610_v49 }
 0x1b0   : > { %613 = vadd.xlane.f32.xlu1 %v612_v51 }
 0x1c1   : > { %657 = vperm.xlu1 %872, %v654_v6  }
 0x239   : > { %v571_v52 = vpop.xlane.xlu1 %570 }
 0x23a   : > { %v572_v53 = vrot.slane %v571_v52, 4 }
 0x23c   : > { %v573_v54 = vadd.f32 %v572_v53, %v571_v52 }
 0x23d   : > { %v614_v8 = vpop.xlane.xlu1 %613 }
 0x23e   : > { %v574_v55 = vrot.slane %v573_v54, 2  ;;  %v615_v9 = vrot.slane %v614_v8, 4 }
 0x240   : > { %v575_v56 = vadd.f32 %v574_v55, %v573_v54  ;;  %v616_v12 = vadd.f32 %v615_v9, %v614_v8 }
 0x241   : > { %v658_v50 = vpop.permute.xlu1 %657 }
 0x242   : > { %v576_v57 = vrot.slane %v575_v56, 1  ;;  %v617_v13 = vrot.slane %v616_v12, 2 }
 0x244   : > { %v577_v58 = vadd.f32 %v576_v57, %v575_v56  ;;  %v618_v17 = vadd.f32 %v617_v13, %v616_v12 }
 0x246   : > { %801 = vpush %v577_v58  ;;  %v619_v20 = vrot.slane %v618_v17, 1 }
 0x248   : > { %v620_v23 = vadd.f32 %v619_v20, %v618_v17 }
 0x277   : > { %s802_s15 = spop %801 }
 0x278   : > { %v579_v59 = vstv %s802_s15  ;;  %s1218_s15 = scalar_lea.hbm %s1266_s6, %s792_s28 }
 0x279   : > { %v581_v60 = vmul.f32 0.0009765625, %v579_v59 }
 0x27b   : > { %v582_v61 = vsub.f32 %v563_v41, %v581_v60  ;;  %v583_v62 = vsub.f32 %v565_v43, %v581_v60 }
 0x27d   : > { %v584_v63 = vmul.f32 %v582_v61, %v582_v61  ;;  %v585_v2 = vmul.f32 %v583_v62, %v583_v62 }
 0x27f   : > { %v586_v3 = vsel %vm470_vm4, %v584_v63, 0.0  ;;  %v587_v4 = vsel %vm470_vm4, %v585_v2, 0.0 }
 0x280   : > { %v588_v5 = vadd.f32 %v587_v4, %v586_v3 }
 0x282   : > { %589 = vadd.xlane.f32.xlu0 %v588_v5 }
 0x30f   : > { %v590_v14 = vpop.xlane.xlu0 %589 }
 0x310   : > { %v591_v15 = vrot.slane %v590_v14, 4 }
 0x312   : > { %v592_v16 = vadd.f32 %v591_v15, %v590_v14 }
 0x314   : > { %v593_v18 = vrot.slane %v592_v16, 2 }
 0x316   : > { %v594_v19 = vadd.f32 %v593_v18, %v592_v16 }
 0x318   : > { %v595_v21 = vrot.slane %v594_v19, 1 }
 0x31a   : > { %v596_v22 = vadd.f32 %v595_v21, %v594_v19 }
 0x31c   : > { %803 = vpush %v596_v22 }
 0x31d   : > { %805 = vpush %v620_v23 }
 0x34d   : > { %s804_s11 = spop %803 }
 0x34e   : > { %s806_s9 = spop %805  ;;  %v598_v1 = vstv %s804_s11  ;;  %s918_s11 = sshll.u32 %s995_s16, 4  ;;  %s919_s11 = int_to_ptr.vmem [resolvable:$false] %s918_s11 }
 0x34f   : > { %v622_v24 = vstv %s806_s9  ;;  %v599_v0 = vmul.f32 0.0009765625, %v598_v1  ;;  %s920_s9 = scalar_lea.vmem %s919_s11, 512  ;;  %p921_p2 = scmp.lt.s32.totalorder %s1220_s10, %s919_s11 }
 0x350   : > { %v623_v25 = vmul.f32 0.0009765625, %v622_v24  ;;  %p922_p3 = scmp.lt.s32.totalorder %s920_s9, %s914_s25 }
 0x351   : > { %v600_v10 = vadd.f32 1e-05, %v599_v0 }
 0x352   : > { %v624_v26 = vsub.f32 %v563_v41, %v623_v25  ;;  %v625_v27 = vsub.f32 %v565_v43, %v623_v25  ;;  %p923_p4 = por %p922_p3, %p921_p2 }
 0x353   : > { %874 = vrsqrt.f32 %v600_v10 }
 0x354   : > { %v626_v28 = vmul.f32 %v624_v26, %v624_v26  ;;  %v627_v29 = vmul.f32 %v625_v27, %v625_v27  ;;  %p924_p7 = pnand %p923_p4, %p917_p12 }
 0x356   : > { %v630_v30 = vrot.slane %v626_v28, 4  ;;  %v631_v31 = vrot.slane %v627_v29, 4 }
 0x358   : > { %v634_v32 = vsel %vm470_vm4, %v630_v30, 0.0  ;;  %v635_v33 = vsel %vm470_vm4, %v631_v31, 0.0 }
 0x359   : > { %v636_v34 = vadd.f32 %v635_v33, %v634_v32 }
 0x35b   : > { %637 = vadd.xlane.f32.xlu0 %v636_v34 }
 0x35d   : > { %v875_v44 = vpop.eup %874 }
 0x35e   : > { %v602_v46 = vmul.f32 %v875_v44, %v582_v61  ;;  %v603_v47 = vmul.f32 %v875_v44, %v583_v62 }
 0x371   : > { %665 = vperm.xlu0 %871, %v662_v35  }
 0x3e8   : > { %v638_v7 = vpop.xlane.xlu0 %637 }
 0x3e9   : > { %v639_v36 = vrot.slane %v638_v7, 4 }
 0x3eb   : > { %v640_v11 = vadd.f32 %v639_v36, %v638_v7 }
 0x3ed   : > { %v641_v37 = vrot.slane %v640_v11, 2 }
 0x3ef   : > { %v642_v38 = vadd.f32 %v641_v37, %v640_v11 }
 0x3f0   : > { %v666_v55 = vpop.permute.xlu0 %665 }
 0x3f1   : > { %v643_v39 = vrot.slane %v642_v38, 1 }
 0x3f3   : > { %v644_v40 = vadd.f32 %v643_v39, %v642_v38 }
 0x3f5   : > { %807 = vpush %v644_v40 }
 0x426   : > { %s808_s19 = spop %807 }
 0x427   : > { %v646_v41 = vstv %s808_s19 }
 0x428   : > { %v647_v42 = vmul.f32 0.0009765625, %v646_v41 }
 0x42a   : > { %v648_v43 = vadd.f32 1e-05, %v647_v42 }
 0x42c   : > { %876 = vrsqrt.f32 %v648_v43 }
 0x436   : > { %v877_v45 = vpop.eup %876 }
 0x437   : > { %v650_v48 = vmul.f32 %v877_v45, %v624_v26  ;;  %v651_v49 = vmul.f32 %v877_v45, %v625_v27 }
 0x439   : > { %v652_v51 = vsel %vm470_vm4, %v602_v46, %v650_v48  ;;  %v653_v52 = vsel %vm470_vm4, %v603_v47, %v651_v49 }
 0x43a   : > { %v660_v53 = vmul.f32 %v658_v50, %v652_v51  ;;  %v661_v54 = vmul.f32 %v658_v50, %v653_v52 }
 0x43c   : > { %v668_v56 = vadd.f32 %v666_v55, %v660_v53  ;;  %v669_v57 = vadd.f32 %v666_v55, %v661_v54 }
 0x43e   : > { %v784_v58 = vmul.f32 -1.442695, %v668_v56  ;;  %v785_v59 = vmul.f32 -1.442695, %v669_v57 }
 0x440   : > { %878 = vpow2.f32 %v784_v58 }
 0x441   : > { %880 = vpow2.f32 %v785_v59 }
 0x44a   : > { %v879_v60 = vpop.eup %878 }
 0x44b   : > { %v881_v61 = vpop.eup %880  ;;  %v676_v62 = vadd.f32 1.0, %v879_v60 }
 0x44c   : > { %v677_v63 = vadd.f32 1.0, %v881_v61 }
 0x44d   : > { %882 = vrcp.f32 %v676_v62 }
 0x44e   : > { %884 = vrcp.f32 %v677_v63 }
 0x457   : > { %v883_v2 = vpop.eup %882 }
 0x458   : > { %v885_v3 = vpop.eup %884  ;;  %v682_v4 = vmul.f32 %v883_v2, %v668_v56 }
 0x459   : > { %v683_v5 = vmul.f32 %v885_v3, %v669_v57 }
 0x45a   : > { %684 = vst [vmem:[%s259_s29] sm:$0xff] %v682_v4 }
 0x45b   : > { %685 = vst [vmem:[%s259_s29 + $0x8] sm:$0xff] %v683_v5 }
 0x45c   : > { %927 = shalt.err (!%p924_p7)
}
 0x45d   : > { %s928_s17 = scalar_lea.hbm %s1218_s15, 256  ;;  %s932_s20 = scalar_lea.hbm %s1266_s6, 512 }
 0x45e   : > { %p929_p8 = scmp.ne.s32.totalorder %s1218_s15, %s928_s17  ;;  %p933_p1 = scmp.lt.u32.totalorder %s1218_s15, %s1266_s6 }
 0x45f   : > { %p934_p0 = scmp.lt.u32.totalorder %s932_s20, %s928_s17  ;;  %p936_p6 = scmp.lt.u32.totalorder %s928_s17, %s1218_s15 }
 0x460   : > { %p930_p11 = pnand %p929_p8, %p1277_p9 }
 0x461   : > { %p935_p5 = por %p934_p0, %p933_p1 }
 0x462   : > { %p931_p13 = pneg %p930_p11 }
 0x463   : > { %p937_p10 = por %p936_p6, %p935_p5 }
 0x465   : > { %p938_p12 = pnand %p937_p10, %p931_p13 }
 0x467   : > { %941 = shalt.err (!%p938_p12)
}
 0x468   : > { %813 = dma.vmem_to_hbm [thread:$0]  (%p1277_p9), %s1220_s10, 256, %s1218_s15, %s687_s12  }
 0x469 PF: > { %p825_p2 = scmp.ge.s32.totalorder %s980_s24, 2  ;;  %s713_s29 = sand.u32 1, %s968_s21  }
 0x46a   : > { %p1278_p3 = scmp.ne.s32.totalorder %s1271_s8, 0  ;;  %s714_s13 = scalar_lea.sflag [#allocation4], %s713_s29 }
 0x46c   : > { %p820_p4 = pnand %p825_p2, %p1278_p3 }
 0x46e   : > { %963 = dma.done.wait (!%p820_p4), %s714_s13, 256  }
 0x46f   : > { %965 = vsyncadd (!%p820_p4), %s714_s13, 4294967040  ;;  %p17_p7 = scmp.ge.s32.totalorder %s1056_s27, 4   ;;  %s1279_s21 = smov %s972_s22 }
 0x470   : > { %s1280_s22 = smov %s976_s23  ;;  %s1281_s23 = smov %s1067_s30 }
 0x471   : > { %s1282_s24 = smov %s1056_s27  ;;  %19 = sbr.rel (!%p17_p7) target bundleno = 4 (0x4), region = 91 }
 0x478   :  { %719 = vsyncpa [#allocation3], 1 }
 0x479   :  { %721 = vsyncpa [#allocation3 + $0x1], 1 }
 0x47a   :  { %722 = vsyncpa [#allocation4], 1 }
 0x47b   :  { %724 = vsyncpa [#allocation4 + $0x1], 1 }

</bundles_post_ra>
